<compile_context>
chip_gen: v5e
topology: v5e:2x2
jax: 0.10.0
libtpu: 0.0.40
codegen_flags: <defaults>
</compile_context>

<pallas_src>
import functools

import jax
import jax.numpy as jnp
from jax import lax
from jax.experimental import pallas as pl
from jax.experimental.pallas import tpu as pltpu

_LANES = 128


def _round_up(x, m):
    return ((x + m - 1) // m) * m


def _round_down(x, m):
    return (x // m) * m


def _vmem_capacity_bytes():
    """Physical VMEM of the current generation (fallback: v7x-sized 64 MiB)."""
    try:
        return int(pltpu.get_tpu_info().vmem_capacity_bytes)
    except Exception:
        return 64 * 1024 * 1024


def _dice_kernel(pred_ref, tgt_ref, loss_ref, a_sc, b_sc, c_sc, *,
                 eps, length, block_l, apply_sigmoid, naive_dice):
    """Grid = (sample tiles, reduction tiles); reduction axis innermost.

    pred_ref/tgt_ref: (tn, block_l) tile of the flattened (N, L) inputs.
    loss_ref:         (tn, 1) per-sample loss (resident across the j sweep).
    a_sc/b_sc/c_sc:   (tn, 1) f32 partial-sum accumulators (scratch).
    """
    j = pl.program_id(1)

    @pl.when(j == 0)
    def _init():
        a_sc[...] = jnp.zeros_like(a_sc)
        b_sc[...] = jnp.zeros_like(b_sc)
        c_sc[...] = jnp.zeros_like(c_sc)

    x = pred_ref[...].astype(jnp.float32)
    if apply_sigmoid:
        # sigmoid(x) == 0.5*(tanh(x/2)+1): tanh goes to the EUP slot and avoids
        # a per-element divide on the VALU, which already carries the casts,
        # products and accumulates.
        p = 0.5 * (jnp.tanh(0.5 * x) + 1.0)
    else:
        p = x
    t = tgt_ref[...].astype(jnp.float32)

    if length % block_l != 0:
        # The last L-block hangs past the end of the (unpadded) inputs: zero
        # the out-of-range columns. Use select (not multiply) so stale / NaN
        # garbage in the partial block cannot leak into the sums.
        col = j * block_l + lax.broadcasted_iota(jnp.int32, p.shape, 1)
        valid = col < length
        p = jnp.where(valid, p, 0.0)
        t = jnp.where(valid, t, 0.0)

    a_sc[...] += jnp.sum(p * t, axis=1, keepdims=True)
    if naive_dice:
        b_sc[...] += jnp.sum(p, axis=1, keepdims=True)
        c_sc[...] += jnp.sum(t, axis=1, keepdims=True)
    else:
        b_sc[...] += jnp.sum(p * p, axis=1, keepdims=True)
        c_sc[...] += jnp.sum(t * t, axis=1, keepdims=True)

    @pl.when(j == pl.num_programs(1) - 1)
    def _finalize():
        a = a_sc[...]
        b = b_sc[...]
        c = c_sc[...]
        if naive_dice:
            d = (2.0 * a + eps) / (b + c + eps)
        else:
            d = 2.0 * a / ((b + eps) + (c + eps))
        loss_ref[...] = 1.0 - d


def dice_loss_pallas(pred, target, weight=None, *, loss_weight=1.0, eps=1e-3,
                     reduction='mean', naive_dice=False, avg_factor=None,
                     activate=True, use_sigmoid=True):
    """DiceLoss.forward (defaults: sigmoid activation, V-Net dice, mean)."""
    if activate and not use_sigmoid:
        raise NotImplementedError("softmax activation path not implemented")

    n = pred.shape[0]
    pred2 = pred.reshape(n, -1)      # flatten(1): metadata-only, no HBM copy
    tgt2 = target.reshape(n, -1)     # cast to f32 happens inside the kernel
    length = pred2.shape[1]

    # ----- generation-aware tile selection (no input padding, VMEM-safe) ----
    vmem_cap = _vmem_capacity_bytes()
    # Per-block element budget: ~10.7 MiB on v7x (64 MiB VMEM), ~21 MiB on
    # v5e/v6e (128 MiB VMEM).
    budget = max(4 * 1024 * 1024, vmem_cap // 6)

    # Sample tile: prefer >= 2 row blocks so the "parallel" grid axis can be
    # split across v7x's two TensorCores. Must be a multiple of 8 or == N.
    if n <= 8:
        tn = n
    else:
        tn = max(8, min(64, _round_down(n // 2, 8)))

    # Per-element VMEM cost: double-buffered native-dtype inputs plus the f32
    # working set (p, t, products/mask) the compiler may materialize in VMEM.
    pair_bytes = pred2.dtype.itemsize + tgt2.dtype.itemsize
    per_elem = 2 * pair_bytes + 16
    max_elems = budget // per_elem

    if length < _LANES:
        tl = length                                   # full (unpadded) extent
    else:
        tl = _round_down(max(max_elems // tn, _LANES), _LANES)
        tl = min(tl, _round_up(length, _LANES))
    grid = (pl.cdiv(n, tn), pl.cdiv(length, tl))

    # Comfortable headroom above the expected footprint, well below physical
    # VMEM on every generation (v7x: 32 MiB of 64; v5e/v6e: 64 MiB of 128).
    vmem_limit = int(min(vmem_cap // 2, budget * 3))

    kernel = functools.partial(
        _dice_kernel, eps=float(eps), length=int(length), block_l=int(tl),
        apply_sigmoid=bool(activate and use_sigmoid),
        naive_dice=bool(naive_dice))

    per_sample = pl.pallas_call(
        kernel,
        out_shape=jax.ShapeDtypeStruct((n, 1), jnp.float32),
        grid_spec=pltpu.PrefetchScalarGridSpec(
            num_scalar_prefetch=0,
            grid=grid,
            in_specs=[
                pl.BlockSpec((tn, tl), lambda i, j: (i, j)),
                pl.BlockSpec((tn, tl), lambda i, j: (i, j)),
            ],
            out_specs=pl.BlockSpec((tn, 1), lambda i, j: (i, 0)),
            scratch_shapes=[
                pltpu.VMEM((tn, 1), jnp.float32),
                pltpu.VMEM((tn, 1), jnp.float32),
                pltpu.VMEM((tn, 1), jnp.float32),
            ],
        ),
        compiler_params=pltpu.CompilerParams(
            dimension_semantics=("parallel", "arbitrary"),
            vmem_limit_bytes=vmem_limit,
        ),
    )(pred2, tgt2)

    loss = per_sample[:, 0]

    # weight / reduction / avg_factor handling (mmdet weight_reduce_loss);
    # O(N) post-processing, done in plain JAX.
    if weight is not None:
        loss = loss * jnp.reshape(weight, (-1,)).astype(loss.dtype)
    if avg_factor is None:
        if reduction == 'mean':
            loss = jnp.mean(loss)
        elif reduction == 'sum':
            loss = jnp.sum(loss)
    else:
        if reduction == 'mean':
            loss = jnp.sum(loss) / avg_factor
        elif reduction != 'none':
            raise ValueError('avg_factor can not be used with reduction="sum"')
    return loss_weight * loss


def _dice_loss_reference(pred, target, *, loss_weight=1.0, eps=1e-3):
    """Pure-JAX reference mirroring the PyTorch code (for validation)."""
    n = pred.shape[0]
    p = jax.nn.sigmoid(pred.reshape(n, -1).astype(jnp.float32))
    t = target.reshape(n, -1).astype(jnp.float32)
    a = jnp.sum(p * t, axis=1)
    b = jnp.sum(p * p, axis=1) + eps
    c = jnp.sum(t * t, axis=1) + eps
    loss = 1.0 - 2.0 * a / (b + c)
    return loss_weight * jnp.mean(loss)


if __name__ == "__main__":
    key = jax.random.PRNGKey(0)
    k1, k2 = jax.random.split(key)

    # pred: raw logits (N, C, H, W); target: binary mask of same shape.
    x = jax.random.normal(k1, (2, 4, 16, 16), dtype=jnp.float32)
    tgt = (jax.random.uniform(k2, (2, 4, 16, 16)) > 0.5).astype(jnp.float32)

    loss = dice_loss_pallas(x, tgt, loss_weight=1.0, eps=1e-3)
    loss = jax.block_until_ready(loss)

    ref = _dice_loss_reference(x, tgt, loss_weight=1.0, eps=1e-3)
    assert jnp.allclose(loss, ref, atol=1e-4, rtol=1e-4), (loss, ref)

    print("KERNEL_OK")
</pallas_src>

<mosaic_0001>
module attributes {stable_mosaic.version = 11 : i64} {
  func.func @_dice_kernel(%arg0: i32, %arg1: i32, %arg2: memref<2x1024xf32, #tpu.memory_space<vmem>>, %arg3: memref<2x1024xf32, #tpu.memory_space<vmem>>, %arg4: memref<2x1xf32, #tpu.memory_space<vmem>>, %arg5: memref<2x1xf32, #tpu.memory_space<vmem>>, %arg6: memref<2x1xf32, #tpu.memory_space<vmem>>, %arg7: memref<2x1xf32, #tpu.memory_space<vmem>>) attributes {dimension_semantics = [#tpu.dimension_semantics<parallel>, #tpu.dimension_semantics<arbitrary>], iteration_bounds = array<i64: 1, 1>, scalar_prefetch = 0 : i64, scratch_operands = 3 : i64, tpu.core_type = #tpu.core_type<tc>, window_params = [{transform_indices = @transform_0, window_bounds = array<i64: 2, 1024>}, {transform_indices = @transform_1, window_bounds = array<i64: 2, 1024>}, {transform_indices = @transform_2, window_bounds = array<i64: 2, 1>}]} {
    %c0_i32 = arith.constant 0 : i32
    %0 = arith.cmpi eq, %arg1, %c0_i32 : i32
    %1 = arith.extui %0 : i1 to i32
    %c0_i32_0 = arith.constant 0 : i32
    %2 = arith.cmpi ne, %1, %c0_i32_0 : i32
    scf.if %2 {
      %cst_23 = arith.constant 0.000000e+00 : f32
      %33 = vector.broadcast %cst_23 : f32 to vector<2x1xf32>
      %c0_24 = arith.constant 0 : index
      %c0_25 = arith.constant 0 : index
      %34 = vector.load %arg5[%c0_24, %c0_25] : memref<2x1xf32, #tpu.memory_space<vmem>>, vector<2x1xf32>
      tpu.vector_store %arg5[%c0_24, %c0_25], %33 {strides = array<i32>} : memref<2x1xf32, #tpu.memory_space<vmem>>, vector<2x1xf32>,
      %cst_26 = arith.constant 0.000000e+00 : f32
      %35 = vector.broadcast %cst_26 : f32 to vector<2x1xf32>
      %c0_27 = arith.constant 0 : index
      %c0_28 = arith.constant 0 : index
      %36 = vector.load %arg6[%c0_27, %c0_28] : memref<2x1xf32, #tpu.memory_space<vmem>>, vector<2x1xf32>
      tpu.vector_store %arg6[%c0_27, %c0_28], %35 {strides = array<i32>} : memref<2x1xf32, #tpu.memory_space<vmem>>, vector<2x1xf32>,
      %cst_29 = arith.constant 0.000000e+00 : f32
      %37 = vector.broadcast %cst_29 : f32 to vector<2x1xf32>
      %c0_30 = arith.constant 0 : index
      %c0_31 = arith.constant 0 : index
      %38 = vector.load %arg7[%c0_30, %c0_31] : memref<2x1xf32, #tpu.memory_space<vmem>>, vector<2x1xf32>
      tpu.vector_store %arg7[%c0_30, %c0_31], %37 {strides = array<i32>} : memref<2x1xf32, #tpu.memory_space<vmem>>, vector<2x1xf32>,
    } else {
    }
    %c0 = arith.constant 0 : index
    %c0_1 = arith.constant 0 : index
    %3 = vector.load %arg2[%c0, %c0_1] : memref<2x1024xf32, #tpu.memory_space<vmem>>, vector<2x1024xf32>
    %cst = arith.constant 5.000000e-01 : f32
    %4 = vector.broadcast %cst : f32 to vector<2x1024xf32>
    %5 = arith.mulf %4, %3 : vector<2x1024xf32>
    %6 = math.tanh %5 : vector<2x1024xf32>
    %cst_2 = arith.constant 1.000000e+00 : f32
    %7 = vector.broadcast %cst_2 : f32 to vector<2x1024xf32>
    %8 = arith.addf %6, %7 : vector<2x1024xf32>
    %cst_3 = arith.constant 5.000000e-01 : f32
    %9 = vector.broadcast %cst_3 : f32 to vector<2x1024xf32>
    %10 = arith.mulf %9, %8 : vector<2x1024xf32>
    %c0_4 = arith.constant 0 : index
    %c0_5 = arith.constant 0 : index
    %11 = vector.load %arg3[%c0_4, %c0_5] : memref<2x1024xf32, #tpu.memory_space<vmem>>, vector<2x1024xf32>
    %c0_6 = arith.constant 0 : index
    %c0_7 = arith.constant 0 : index
    %12 = vector.load %arg5[%c0_6, %c0_7] : memref<2x1xf32, #tpu.memory_space<vmem>>, vector<2x1xf32>
    %13 = arith.mulf %10, %11 : vector<2x1024xf32>
    %cst_8 = arith.constant dense<0.000000e+00> : vector<2xf32>
    %14 = vector.multi_reduction <add>, %13, %cst_8 [1] : vector<2x1024xf32> to vector<2xf32>
    %15 = vector.shape_cast %14 : vector<2xf32> to vector<2x1xf32>
    %16 = arith.addf %12, %15 : vector<2x1xf32>
    %c0_9 = arith.constant 0 : index
    %c0_10 = arith.constant 0 : index
    %17 = vector.load %arg5[%c0_9, %c0_10] : memref<2x1xf32, #tpu.memory_space<vmem>>, vector<2x1xf32>
    tpu.vector_store %arg5[%c0_9, %c0_10], %16 {strides = array<i32>} : memref<2x1xf32, #tpu.memory_space<vmem>>, vector<2x1xf32>,
    %c0_11 = arith.constant 0 : index
    %c0_12 = arith.constant 0 : index
    %18 = vector.load %arg6[%c0_11, %c0_12] : memref<2x1xf32, #tpu.memory_space<vmem>>, vector<2x1xf32>
    %19 = arith.mulf %10, %10 : vector<2x1024xf32>
    %cst_13 = arith.constant dense<0.000000e+00> : vector<2xf32>
    %20 = vector.multi_reduction <add>, %19, %cst_13 [1] : vector<2x1024xf32> to vector<2xf32>
    %21 = vector.shape_cast %20 : vector<2xf32> to vector<2x1xf32>
    %22 = arith.addf %18, %21 : vector<2x1xf32>
    %c0_14 = arith.constant 0 : index
    %c0_15 = arith.constant 0 : index
    %23 = vector.load %arg6[%c0_14, %c0_15] : memref<2x1xf32, #tpu.memory_space<vmem>>, vector<2x1xf32>
    tpu.vector_store %arg6[%c0_14, %c0_15], %22 {strides = array<i32>} : memref<2x1xf32, #tpu.memory_space<vmem>>, vector<2x1xf32>,
    %c0_16 = arith.constant 0 : index
    %c0_17 = arith.constant 0 : index
    %24 = vector.load %arg7[%c0_16, %c0_17] : memref<2x1xf32, #tpu.memory_space<vmem>>, vector<2x1xf32>
    %25 = arith.mulf %11, %11 : vector<2x1024xf32>
    %cst_18 = arith.constant dense<0.000000e+00> : vector<2xf32>
    %26 = vector.multi_reduction <add>, %25, %cst_18 [1] : vector<2x1024xf32> to vector<2xf32>
    %27 = vector.shape_cast %26 : vector<2xf32> to vector<2x1xf32>
    %28 = arith.addf %24, %27 : vector<2x1xf32>
    %c0_19 = arith.constant 0 : index
    %c0_20 = arith.constant 0 : index
    %29 = vector.load %arg7[%c0_19, %c0_20] : memref<2x1xf32, #tpu.memory_space<vmem>>, vector<2x1xf32>
    tpu.vector_store %arg7[%c0_19, %c0_20], %28 {strides = array<i32>} : memref<2x1xf32, #tpu.memory_space<vmem>>, vector<2x1xf32>,
    %c0_i32_21 = arith.constant 0 : i32
    %30 = arith.cmpi eq, %arg1, %c0_i32_21 : i32
    %31 = arith.extui %30 : i1 to i32
    %c0_i32_22 = arith.constant 0 : i32
    %32 = arith.cmpi ne, %31, %c0_i32_22 : i32
    scf.if %32 {
      %c0_23 = arith.constant 0 : index
      %c0_24 = arith.constant 0 : index
      %33 = vector.load %arg5[%c0_23, %c0_24] : memref<2x1xf32, #tpu.memory_space<vmem>>, vector<2x1xf32>
      %c0_25 = arith.constant 0 : index
      %c0_26 = arith.constant 0 : index
      %34 = vector.load %arg6[%c0_25, %c0_26] : memref<2x1xf32, #tpu.memory_space<vmem>>, vector<2x1xf32>
      %c0_27 = arith.constant 0 : index
      %c0_28 = arith.constant 0 : index
      %35 = vector.load %arg7[%c0_27, %c0_28] : memref<2x1xf32, #tpu.memory_space<vmem>>, vector<2x1xf32>
      %cst_29 = arith.constant 2.000000e+00 : f32
      %36 = vector.broadcast %cst_29 : f32 to vector<2x1xf32>
      %37 = arith.mulf %36, %33 : vector<2x1xf32>
      %cst_30 = arith.constant 1.000000e-03 : f32
      %38 = vector.broadcast %cst_30 : f32 to vector<2x1xf32>
      %39 = arith.addf %34, %38 : vector<2x1xf32>
      %cst_31 = arith.constant 1.000000e-03 : f32
      %40 = vector.broadcast %cst_31 : f32 to vector<2x1xf32>
      %41 = arith.addf %35, %40 : vector<2x1xf32>
      %42 = arith.addf %39, %41 : vector<2x1xf32>
      %43 = arith.divf %37, %42 : vector<2x1xf32>
      %cst_32 = arith.constant 1.000000e+00 : f32
      %44 = vector.broadcast %cst_32 : f32 to vector<2x1xf32>
      %45 = arith.subf %44, %43 : vector<2x1xf32>
      %c0_33 = arith.constant 0 : index
      %c0_34 = arith.constant 0 : index
      %46 = vector.load %arg4[%c0_33, %c0_34] : memref<2x1xf32, #tpu.memory_space<vmem>>, vector<2x1xf32>
      tpu.vector_store %arg4[%c0_33, %c0_34], %45 {strides = array<i32>} : memref<2x1xf32, #tpu.memory_space<vmem>>, vector<2x1xf32>,
    } else {
    }
    return
  }
  func.func @transform_0(%arg0: i32, %arg1: i32) -> (i32, i32) {
    %c0_i32 = arith.constant 0 : i32
    return %arg0, %arg1 : i32, i32
  }
  func.func @transform_1(%arg0: i32, %arg1: i32) -> (i32, i32) {
    %c0_i32 = arith.constant 0 : i32
    return %arg0, %arg1 : i32, i32
  }
  func.func @transform_2(%arg0: i32, %arg1: i32) -> (i32, i32) {
    %c0_i32 = arith.constant 0 : i32
    %c0_i32_0 = arith.constant 0 : i32
    return %arg0, %c0_i32 : i32, i32
  }
}

</mosaic_0001>

<bundles_post_ra>
// kernel: tpu_custom_call.1
= control target key start
LH: loop header
LB: loop body
LE: loop exit
PB: predicated region body
PF: predicated region fallthrough
CT: control target
= control target key end

     0   :  { %7 = vsyncpa [#allocation6], 0  ;;  %s342_s0 = inlined_call_operand.hbm [shape: f32[2,1024], index: 0, kind: input, shape index: {}]   ;;  %s343_s1 = inlined_call_operand.hbm [shape: f32[2,1024], index: 1, kind: input, shape index: {}]   ;;  %s344_s2 = inlined_call_operand.vmem [shape: f32[2,1], index: 2, kind: output, shape index: {}]  }
   0x1   :  { %s14_s11 = sshll.u32 %s342_s0, 4  ;;  %s15_s11 = int_to_ptr.hbm [resolvable:$true] %s14_s11 }
   0x2   :  { %8 = vsyncpa [#allocation8], 0  ;;  %s284_s12 = smov [#allocation5]   ;;  %s25_s16 = sshll.u32 %s343_s1, 4  ;;  %s26_s16 = int_to_ptr.hbm [resolvable:$true] %s25_s16 }
   0x3   :  { %s16_s13 = sshll.u32 %s284_s12, 4  ;;  %s285_s17 = smov [#allocation7]   ;;  %s17_s13 = int_to_ptr.vmem [resolvable:$true] %s16_s13 }
   0x4   :  { %19 = dma.hbm_to_vmem [thread:$0]  %s15_s11, 256, %s17_s13, [#allocation6]  }
   0x5   :  { %s27_s18 = sshll.u32 %s285_s17, 4  ;;  %s28_s18 = int_to_ptr.vmem [resolvable:$true] %s27_s18 }
   0x6   :  { %30 = dma.hbm_to_vmem [thread:$0]  %s26_s16, 256, %s28_s18, [#allocation8]  }
   0x7   :  { %280 = dma.done.wait [#allocation6], 256  }
   0x8   :  { %281 = vsyncadd [#allocation6], 4294967040 }
   0x9   :  { %282 = dma.done.wait [#allocation8], 256  }
   0xa   :  { %283 = vsyncadd [#allocation8], 4294967040  ;;  %v47_v0 = vld [vmem:[#allocation5] sm:$0xff]  ;;  %v48_v1 = vld [vmem:[#allocation5 + $0x8] sm:$0xff]  ;;  %vm83_vm0 = vcmask 1041408   ;;  %vm43_vm1 = vcmask 1024  }
   0xb   :  { %v49_v2 = vmul.f32 0.5, %v47_v0  ;;  %v50_v3 = vmul.f32 0.5, %v48_v1  ;;  %v57_v8 = vld [vmem:[#allocation7] sm:$0xff]  ;;  %v58_v10 = vld [vmem:[#allocation7 + $0x8] sm:$0xff]  ;;  %v286_v53 = vmov 0.0  }
   0xc   :  { %v148_v32 = vmul.f32 %v57_v8, %v57_v8  ;;  %v149_v35 = vmul.f32 %v58_v10, %v58_v10  ;;  %45 = vst.msk [vmem:[#allocation3] sm:$0x3] %vm43_vm1, %v286_v53 }
   0xd   :  { %226 = vtanh.f32 %v49_v2  ;;  %44 = vst.msk [vmem:[#allocation2] sm:$0x3] %vm43_vm1, %v286_v53 }
   0xe   :  { %228 = vtanh.f32 %v50_v3  ;;  %46 = vst.msk [vmem:[#allocation4] sm:$0x3] %vm43_vm1, %v286_v53 }
  0x13   :  { %v227_v4 = vpop.eup %226 }
  0x14   :  { %v229_v5 = vpop.eup %228  ;;  %v53_v6 = vadd.f32 1.0, %v227_v4 }
  0x15   :  { %v54_v7 = vadd.f32 1.0, %v229_v5 }
  0x16   :  { %v55_v9 = vmul.f32 0.5, %v53_v6 }
  0x17   :  { %v56_v11 = vmul.f32 0.5, %v54_v7 }
  0x18   :  { %v60_v12 = vmul.f32 %v57_v8, %v55_v9  ;;  %v105_v16 = vmul.f32 %v55_v9, %v55_v9 }
  0x19   :  { %v61_v13 = vmul.f32 %v58_v10, %v56_v11  ;;  %v106_v19 = vmul.f32 %v56_v11, %v56_v11 }
  0x1a   :  { %64 = vst [vmem:[#allocation1] ss:$4 sm:$0xff] %v60_v12 }
  0x1b   :  { %66 = vst [vmem:[#allocation1 + $0x20] ss:$4 sm:$0xff] %v61_v13 }
  0x21   :  { %v67_v14 = vld.sshfl [vmem:[#allocation1] sm:$0xff pattern:$0x73625140]  ;;  %v68_v15 = vld.sshfl [vmem:[#allocation1 + $0x8] sm:$0xff pattern:$0x73625140] }
  0x22   :  { %v69_v17 = vld.sshfl [vmem:[#allocation1 + $0x10] sm:$0xff pattern:$0x73625140]  ;;  %v70_v18 = vld.sshfl [vmem:[#allocation1 + $0x18] sm:$0xff pattern:$0x73625140] }
  0x23   :  { %v71_v20 = vld.sshfl [vmem:[#allocation1 + $0x20] sm:$0xff pattern:$0x73625140]  ;;  %v72_v21 = vld.sshfl [vmem:[#allocation1 + $0x28] sm:$0xff pattern:$0x73625140] }
  0x24   :  { %v73_v22 = vld.sshfl [vmem:[#allocation1 + $0x30] sm:$0xff pattern:$0x73625140]  ;;  %v74_v23 = vld.sshfl [vmem:[#allocation1 + $0x38] sm:$0xff pattern:$0x73625140] }
  0x25   :  { %109 = vst [vmem:[#allocation1] ss:$4 sm:$0xff] %v105_v16  ;;  %v84_v24 = vsel %vm83_vm0, %v67_v14, 0.0  ;;  %v85_v25 = vsel %vm83_vm0, %v68_v15, 0.0  ;;  %v87_v26 = vsel %vm83_vm0, %v69_v17, 0.0  ;;  %v89_v28 = vsel %vm83_vm0, %v70_v18, 0.0 }
  0x26   :  { %111 = vst [vmem:[#allocation1 + $0x20] ss:$4 sm:$0xff] %v106_v19  ;;  %v86_v27 = vadd.f32 %v85_v25, %v84_v24  ;;  %v91_v29 = vsel %vm83_vm0, %v71_v20, 0.0  ;;  %v93_v46 = vsel %vm83_vm0, %v72_v21, 0.0  ;;  %v95_v50 = vsel %vm83_vm0, %v73_v22, 0.0 }
  0x27   :  { %v97_v55 = vsel %vm83_vm0, %v74_v23, 0.0  ;;  %v59_v24 = vld [vmem:[#allocation2] sm:$0x3] }
  0x28   :  { %v88_v36 = vadd.f32 %v87_v26, %v86_v27  ;;  %v104_v27 = vld [vmem:[#allocation3] sm:$0x3] }
  0x2a   :  { %v90_v41 = vadd.f32 %v89_v28, %v88_v36 }
  0x2c   :  { %v112_v30 = vld.sshfl [vmem:[#allocation1] sm:$0xff pattern:$0x73625140]  ;;  %v113_v31 = vld.sshfl [vmem:[#allocation1 + $0x8] sm:$0xff pattern:$0x73625140]  ;;  %v92_v48 = vadd.f32 %v91_v29, %v90_v41 }
  0x2d   :  { %v114_v33 = vld.sshfl [vmem:[#allocation1 + $0x10] sm:$0xff pattern:$0x73625140]  ;;  %v115_v34 = vld.sshfl [vmem:[#allocation1 + $0x18] sm:$0xff pattern:$0x73625140] }
  0x2e   :  { %v116_v37 = vld.sshfl [vmem:[#allocation1 + $0x20] sm:$0xff pattern:$0x73625140]  ;;  %v117_v38 = vld.sshfl [vmem:[#allocation1 + $0x28] sm:$0xff pattern:$0x73625140]  ;;  %v94_v52 = vadd.f32 %v93_v46, %v92_v48 }
  0x2f   :  { %v118_v39 = vld.sshfl [vmem:[#allocation1 + $0x30] sm:$0xff pattern:$0x73625140]  ;;  %v119_v40 = vld.sshfl [vmem:[#allocation1 + $0x38] sm:$0xff pattern:$0x73625140] }
  0x30   :  { %v128_v42 = vsel %vm83_vm0, %v112_v30, 0.0  ;;  %v129_v43 = vsel %vm83_vm0, %v113_v31, 0.0  ;;  %v131_v44 = vsel %vm83_vm0, %v114_v33, 0.0  ;;  %152 = vst [vmem:[#allocation1] ss:$4 sm:$0xff] %v148_v32  ;;  %v133_v47 = vsel %vm83_vm0, %v115_v34, 0.0 }
  0x31   :  { %v130_v45 = vadd.f32 %v129_v43, %v128_v42  ;;  %154 = vst [vmem:[#allocation1 + $0x20] ss:$4 sm:$0xff] %v149_v35  ;;  %v135_v51 = vsel %vm83_vm0, %v116_v37, 0.0  ;;  %v137_v56 = vsel %vm83_vm0, %v117_v38, 0.0  ;;  %v96_v57 = vadd.f32 %v95_v50, %v94_v52  ;;  %v147_v30 = vld [vmem:[#allocation4] sm:$0x3] }
  0x32   :  { %v139_v59 = vsel %vm83_vm0, %v118_v39, 0.0  ;;  %v141_v1 = vsel %vm83_vm0, %v119_v40, 0.0 }
  0x33   :  { %v132_v49 = vadd.f32 %v131_v44, %v130_v45  ;;  %v98_v63 = vadd.f32 %v97_v55, %v96_v57 }
  0x35   :  { %v134_v54 = vadd.f32 %v133_v47, %v132_v49  ;;  %99 = vadd.xlane.f32.xlu1 %v98_v63 }
  0x37   :  { %v136_v58 = vadd.f32 %v135_v51, %v134_v54  ;;  %v155_v60 = vld.sshfl [vmem:[#allocation1] sm:$0xff pattern:$0x73625140]  ;;  %v156_v61 = vld.sshfl [vmem:[#allocation1 + $0x8] sm:$0xff pattern:$0x73625140] }
  0x38   :  { %v157_v62 = vld.sshfl [vmem:[#allocation1 + $0x10] sm:$0xff pattern:$0x73625140]  ;;  %v158_v2 = vld.sshfl [vmem:[#allocation1 + $0x18] sm:$0xff pattern:$0x73625140] }
  0x39   :  { %v138_v0 = vadd.f32 %v137_v56, %v136_v58  ;;  %v171_v4 = vsel %vm83_vm0, %v155_v60, 0.0  ;;  %v172_v5 = vsel %vm83_vm0, %v156_v61, 0.0  ;;  %v174_v6 = vsel %vm83_vm0, %v157_v62, 0.0  ;;  %v159_v7 = vld.sshfl [vmem:[#allocation1 + $0x20] sm:$0xff pattern:$0x73625140] }
  0x3a   :  { %v173_v8 = vadd.f32 %v172_v5, %v171_v4  ;;  %v176_v10 = vsel %vm83_vm0, %v158_v2, 0.0  ;;  %v160_v11 = vld.sshfl [vmem:[#allocation1 + $0x28] sm:$0xff pattern:$0x73625140]  ;;  %v178_v13 = vsel %vm83_vm0, %v159_v7, 0.0 }
  0x3b   :  { %v140_v3 = vadd.f32 %v139_v59, %v138_v0  ;;  %v161_v14 = vld.sshfl [vmem:[#allocation1 + $0x30] sm:$0xff pattern:$0x73625140]  ;;  %v180_v16 = vsel %vm83_vm0, %v160_v11, 0.0 }
  0x3c   :  { %v175_v12 = vadd.f32 %v174_v6, %v173_v8  ;;  %v162_v17 = vld.sshfl [vmem:[#allocation1 + $0x38] sm:$0xff pattern:$0x73625140]  ;;  %v182_v19 = vsel %vm83_vm0, %v161_v14, 0.0 }
  0x3d   :  { %v142_v9 = vadd.f32 %v141_v1, %v140_v3  ;;  %v184_v21 = vsel %vm83_vm0, %v162_v17, 0.0 }
  0x3e   :  { %v177_v15 = vadd.f32 %v176_v10, %v175_v12 }
  0x3f   :  { %143 = vadd.xlane.f32.xlu0 %v142_v9 }
  0x40   :  { %v179_v18 = vadd.f32 %v178_v13, %v177_v15 }
  0x42   :  { %v181_v20 = vadd.f32 %v180_v16, %v179_v18 }
  0x44   :  { %v183_v22 = vadd.f32 %v182_v19, %v181_v20 }
  0x46   :  { %v185_v23 = vadd.f32 %v184_v21, %v183_v22 }
  0x48   :  { %186 = vadd.xlane.f32.xlu0 %v185_v23 }
  0xa8   :  { %v100_v25 = vpop.xlane.xlu1 %99 }
  0xa9   :  { %v101_v26 = vadd.f32 %v100_v25, %v59_v24 }
  0xab   :  { %103 = vst.msk [vmem:[#allocation2] sm:$0x3] %vm43_vm1, %v101_v26 }
  0xb2   :  { %v144_v28 = vpop.xlane.xlu0 %143  ;;  %v193_v41 = vld [vmem:[#allocation2] sm:$0x3] }
  0xb3   :  { %v145_v29 = vadd.f32 %v144_v28, %v104_v27  ;;  %v196_v45 = vmul.f32 2.0, %v193_v41 }
  0xb5   :  { %146 = vst.msk [vmem:[#allocation3] sm:$0x3] %vm43_vm1, %v145_v29 }
  0xbb   :  { %v187_v31 = vpop.xlane.xlu0 %186 }
  0xbc   :  { %v188_v32 = vadd.f32 %v187_v31, %v147_v30  ;;  %v194_v33 = vld [vmem:[#allocation3] sm:$0x3] }
  0xbd   :  { %v197_v35 = vadd.f32 0.001, %v194_v33 }
  0xbe   :  { %189 = vst.msk [vmem:[#allocation4] sm:$0x3] %vm43_vm1, %v188_v32 }
  0xc5   :  { %v195_v34 = vld [vmem:[#allocation4] sm:$0x3] }
  0xc6   :  { %v198_v36 = vadd.f32 0.001, %v195_v34 }
  0xc8   :  { %v199_v37 = vadd.f32 %v198_v36, %v197_v35 }
  0xca   :  { %230 = vrcp.f32 %v199_v37  ;;  %v211_v42 = vand.u32 2147483648, %v199_v37  ;;  %v209_v44 = vand.u32 2147483647, %v199_v37  ;;  %vm205_vm3 = vweird.f32 %v199_v37 }
  0xcc   :  { %v212_v47 = vor.u32 1.1754944e-38, %v211_v42  ;;  %vm210_vm5 = vcmp.eq.f32.partialorder %v209_v44, 8.507059e+37 }
  0xd0   :  { %v231_v38 = vpop.eup %230 }
  0xd1   :  { %v201_v39 = vmul.f32 %v231_v38, %v199_v37  ;;  %vm206_vm2 = vweird.f32 %v231_v38 }
  0xd2   :  { %vm207_vm4 = vmor %vm205_vm3, %vm206_vm2 }
  0xd3   :  { %v202_v40 = vsub.f32 1.0, %v201_v39 }
  0xd5   :  { %v203_v43 = vmul.f32 %v231_v38, %v202_v40 }
  0xd7   :  { %v204_v46 = vadd.f32 %v231_v38, %v203_v43 }
  0xd9   :  { %v208_v48 = vsel %vm207_vm4, %v231_v38, %v204_v46 }
  0xda   :  { %v213_v49 = vsel %vm210_vm5, %v212_v47, %v208_v48 }
  0xdb   :  { %v214_v50 = vmul.f32 %v213_v49, %v196_v45 }
  0xdd   :  { %v215_v51 = vsub.f32 1.0, %v214_v50 }
  0xdf   :  { %216 = vst.msk [vmem:[%s344_s2] sm:$0x3] %vm43_vm1, %v215_v51 }
  0xe0   :  { %221 = vsyncpa [#allocation6], 1 }
  0xe1   :  { %222 = vsyncpa [#allocation8], 1 }

</bundles_post_ra>
